<compile_context>
chip_gen: v7x
topology: tpu7x:2x2x1
jax: 0.10.0
libtpu: 0.0.40
codegen_flags: <defaults>
</compile_context>

<pallas_src>
import numpy as np
import jax
import jax.numpy as jnp
from jax.experimental import pallas as pl
from jax.experimental.pallas import tpu as pltpu

JITTER = 1e-4


# ---------------------------------------------------------------------------
# Pallas kernel: all (hyper, output) GP conditionals, diagonal covariance, in
# one shot.  Row index n of the stacked operands is (h * out_size + o) * M + m.
# ---------------------------------------------------------------------------
def _svgp_batched_kernel(xt_ref, zsc_ref, zz_ref, ampr_ref, xx_ref,
                         lblk_ref, stblk_ref, ablk_ref, ones_ref, ampho_ref,
                         mu_ref, var_ref):
    # RBF kernel Kuf for every (h, o, m) row at once:
    #   d2[n, b] = sum_d ls_inv2[h,d] * (z[o,m,d] - x[b,d])^2
    #            = zz[n] + xx[n, b] - 2 * (z*ls_inv2)[n, :] . x[b, :]
    cross = jnp.dot(zsc_ref[...], xt_ref[...],
                    preferred_element_type=jnp.float32)              # (HOM, B)
    d2 = jnp.maximum(zz_ref[...] + xx_ref[...] - 2.0 * cross, 0.0)
    kuf = ampr_ref[...] * jnp.exp(-0.5 * d2)                         # (HOM, B)

    # Block-diagonal Lkuu^{-1} application (triangular solve as matmul).
    kinv = jnp.dot(lblk_ref[...], kuf,
                   preferred_element_type=jnp.float32)               # (HOM, B)
    # Block-diagonal S^T application, S = Lkuu^{-1} u_tril.
    vec2 = jnp.dot(stblk_ref[...], kinv,
                   preferred_element_type=jnp.float32)               # (HOM, B)

    # mu = A_blk @ kinv, where row (h,o) of A_blk holds (Lkuu^{-1} u_mean).
    mu_ref[...] = jnp.dot(ablk_ref[...], kinv,
                          preferred_element_type=jnp.float32)        # (HO, B)

    # diag1 / diag2: per-(h,o) sums over M, expressed as matmuls with a
    # block-structured ones matrix so the reduce rides the MXU.
    diag1 = jnp.dot(ones_ref[...], kinv * kinv,
                    preferred_element_type=jnp.float32)              # (HO, B)
    diag2 = jnp.dot(ones_ref[...], vec2 * vec2,
                    preferred_element_type=jnp.float32)              # (HO, B)

    var_ref[...] = ampho_ref[...] - diag1 + diag2                    # (HO, B)


def _block_diag(blocks):
    """blocks: (N, M, M) -> (N*M, N*M) block-diagonal matrix."""
    N, M, _ = blocks.shape
    eye_n = jnp.eye(N, dtype=blocks.dtype)
    big = jnp.einsum('nab,nk->nakb', blocks, eye_n)   # (N, M, N, M)
    return big.reshape(N * M, N * M)


# ---------------------------------------------------------------------------
# Plain-JAX glue (parameter setup + O(M^3) + hyper-only precompute, tiny).
# ---------------------------------------------------------------------------
def vec2tril(vec, m):
    rows, cols = jnp.tril_indices(m)
    tril = jnp.zeros(vec.shape[:-1] + (m, m), vec.dtype)
    return tril.at[..., rows, cols].set(vec)


def rbf_kernel(ls_inv2, amp, xa, xb):
    """ls_inv2:(H,D) amp:(H,) xa:(out,Ma,D) xb:(out,Mb,D) -> (H,out,Ma,Mb)."""
    sls = jnp.sqrt(ls_inv2)[:, None, None, :]
    xas = xa[None] * sls
    xbs = xb[None] * sls
    d2 = (jnp.sum(xas ** 2, -1)[..., :, None]
          + jnp.sum(xbs ** 2, -1)[..., None, :]
          - 2.0 * jnp.einsum('hoad,hobd->hoab', xas, xbs))
    return amp[:, None, None, None] * jnp.exp(-0.5 * jnp.maximum(d2, 0.0))


@jax.jit
def svgp_forward(x, z, u_mean, u_tril, ls_inv2, amp):
    """Forward pass of GlobalContinualSVGP (no prev_params, loss_cache=False).

    Returns pred_mu, pred_var with shape (n_hypers, out_size, B)."""
    H, D = ls_inv2.shape
    out_size, M, _ = z.shape
    B = x.shape[0]
    N = H * out_size          # number of (hyper, output) pairs
    HOM = N * M               # stacked row count

    # --- O(M^3) precompute: Kuu, Cholesky, triangular solves (tiny) ---------
    kuu = rbf_kernel(ls_inv2, amp, z, z)                          # (H,out,M,M)
    lkuu = jnp.linalg.cholesky(kuu + JITTER * jnp.eye(M, dtype=kuu.dtype))
    eye_m = jnp.broadcast_to(jnp.eye(M, dtype=kuu.dtype), lkuu.shape)
    linv = jax.scipy.linalg.solve_triangular(lkuu, eye_m, lower=True)
    a = linv @ jnp.broadcast_to(u_mean[None], (H,) + u_mean.shape)  # (H,out,M,1)
    s = linv @ jnp.broadcast_to(u_tril[None], (H,) + u_tril.shape)  # (H,out,M,M)

    # --- Hyper-/output-only precompute hoisted out of the kernel ------------
    zsc = (ls_inv2[:, None, None, :] * z[None]).reshape(HOM, D)            # (HOM, D)
    zz = jnp.sum((z[None] ** 2) * ls_inv2[:, None, None, :],
                 axis=-1).reshape(HOM, 1)                                   # (HOM, 1)
    xx = (x ** 2) @ ls_inv2.T                                               # (B, H)
    xx_rows = jnp.broadcast_to(xx.T[:, None, :],
                               (H, out_size * M, B)).reshape(HOM, B)        # (HOM, B)
    ampr = jnp.broadcast_to(amp[:, None], (H, out_size * M)).reshape(HOM, 1)
    ampho = jnp.broadcast_to(amp[:, None], (H, out_size)).reshape(N, 1)
    xt = x.T                                                                # (D, B)

    lblk = _block_diag(linv.reshape(N, M, M))                               # (HOM, HOM)
    stblk = _block_diag(jnp.swapaxes(s, -1, -2).reshape(N, M, M))           # (HOM, HOM)
    eye_n = jnp.eye(N, dtype=jnp.float32)
    ablk = (eye_n[:, :, None] * a.reshape(N, M)[:, None, :]).reshape(N, HOM)
    ones_blk = jnp.repeat(eye_n, M, axis=1)                                 # (N, HOM)

    vmem = pl.BlockSpec(memory_space=pltpu.MemorySpace.VMEM)
    mu2, var2 = pl.pallas_call(
        _svgp_batched_kernel,
        out_shape=(jax.ShapeDtypeStruct((N, B), jnp.float32),
                   jax.ShapeDtypeStruct((N, B), jnp.float32)),
        in_specs=[vmem] * 10,
        out_specs=(vmem, vmem),
    )(xt, zsc, zz, ampr, xx_rows, lblk, stblk, ablk, ones_blk, ampho)

    return mu2.reshape(H, out_size, B), var2.reshape(H, out_size, B)


def svgp_forward_reference(x, z, u_mean, u_tril, ls_inv2, amp):
    """Pure-JAX reference with identical math, for verification."""
    H, D = ls_inv2.shape
    out_size, M, _ = z.shape
    B = x.shape[0]

    kuu = rbf_kernel(ls_inv2, amp, z, z)
    lkuu = jnp.linalg.cholesky(kuu + JITTER * jnp.eye(M, dtype=kuu.dtype))
    eye = jnp.broadcast_to(jnp.eye(M, dtype=kuu.dtype), lkuu.shape)
    linv = jax.scipy.linalg.solve_triangular(lkuu, eye, lower=True)

    x_e = jnp.broadcast_to(x[None], (out_size, B, D))
    kuf = rbf_kernel(ls_inv2, amp, z, x_e)                        # (H,out,M,B)
    kinvkuf = linv @ kuf
    a = linv @ jnp.broadcast_to(u_mean[None], (H,) + u_mean.shape)
    s = linv @ jnp.broadcast_to(u_tril[None], (H,) + u_tril.shape)

    mu = jnp.einsum('homb,hom->hob', kinvkuf, a[..., 0])
    diag1 = jnp.sum(kinvkuf ** 2, axis=-2)
    vec2 = jnp.einsum('homk,homb->hokb', s, kinvkuf)
    diag2 = jnp.sum(vec2 ** 2, axis=-2)
    var = amp[:, None, None] - diag1 + diag2
    return mu, var


if __name__ == "__main__":
    n_hypers = 2       # n_var_samples
    out_size = 4
    M = 8              # number of inducing points
    D = 16             # in_size
    B = 128            # batch

    key = jax.random.PRNGKey(0)
    k1, k2, k3, k4, k5 = jax.random.split(key, 5)

    # Deterministic parameter init (mirrors __init__ shapes).
    z = jax.random.normal(k1, (out_size, M, D), jnp.float32)              # z_init
    u_mean = 0.5 * jax.random.normal(k2, (out_size, M, 1), jnp.float32)   # N(0, 0.5)
    u_tril_vec = jnp.ones((out_size, M * (M + 1) // 2), jnp.float32)
    u_tril = vec2tril(u_tril_vec, M)

    # Deterministic "sampled" RBF kernel hypers theta = (log lengthscale, log var).
    log_ls = 0.1 * jax.random.normal(k4, (n_hypers, D), jnp.float32)
    log_amp = 0.1 * jax.random.normal(k5, (n_hypers,), jnp.float32)
    ls_inv2 = jnp.exp(-2.0 * log_ls)     # 1 / lengthscale^2
    amp = jnp.exp(log_amp)               # kernel variance

    # Input data.
    x = jax.random.normal(k3, (B, D), jnp.float32)

    pred_mu, pred_var = svgp_forward(x, z, u_mean, u_tril, ls_inv2, amp)
    jax.block_until_ready((pred_mu, pred_var))

    ref_mu, ref_var = svgp_forward_reference(x, z, u_mean, u_tril, ls_inv2, amp)
    np.testing.assert_allclose(np.asarray(pred_mu), np.asarray(ref_mu),
                               rtol=5e-3, atol=5e-3)
    np.testing.assert_allclose(np.asarray(pred_var), np.asarray(ref_var),
                               rtol=5e-3, atol=5e-3)
    assert pred_mu.shape == (n_hypers, out_size, B)
    assert pred_var.shape == (n_hypers, out_size, B)

    print("KERNEL_OK")
</pallas_src>

<mosaic_0001>
module attributes {stable_mosaic.version = 11 : i64} {
  func.func @_svgp_batched_kernel(%arg0: memref<16x128xf32, #tpu.memory_space<vmem>>, %arg1: memref<64x16xf32, #tpu.memory_space<vmem>>, %arg2: memref<64x1xf32, #tpu.memory_space<vmem>>, %arg3: memref<64x1xf32, #tpu.memory_space<vmem>>, %arg4: memref<64x128xf32, #tpu.memory_space<vmem>>, %arg5: memref<64x64xf32, #tpu.memory_space<vmem>>, %arg6: memref<64x64xf32, #tpu.memory_space<vmem>>, %arg7: memref<8x64xf32, #tpu.memory_space<vmem>>, %arg8: memref<8x64xf32, #tpu.memory_space<vmem>>, %arg9: memref<8x1xf32, #tpu.memory_space<vmem>>, %arg10: memref<8x128xf32, #tpu.memory_space<vmem>>, %arg11: memref<8x128xf32, #tpu.memory_space<vmem>>) attributes {dimension_semantics = [], scalar_prefetch = 0 : i64, scratch_operands = 0 : i64, tpu.core_type = #tpu.core_type<tc>} {
    %c0 = arith.constant 0 : index
    %c0_0 = arith.constant 0 : index
    %0 = vector.load %arg1[%c0, %c0_0] : memref<64x16xf32, #tpu.memory_space<vmem>>, vector<64x16xf32>
    %c0_1 = arith.constant 0 : index
    %c0_2 = arith.constant 0 : index
    %1 = vector.load %arg0[%c0_1, %c0_2] : memref<16x128xf32, #tpu.memory_space<vmem>>, vector<16x128xf32>
    %cst = arith.constant dense<0.000000e+00> : vector<64x128xf32>
    %2 = tpu.matmul %0, %1, %cst {dimension_numbers = #tpu.dot_dimension_numbers<[1], [0], [0], [1], [0, 0, 1, 1], [], []>} : vector<64x16xf32>, vector<16x128xf32>, vector<64x128xf32> -> vector<64x128xf32>
    %c0_3 = arith.constant 0 : index
    %c0_4 = arith.constant 0 : index
    %3 = vector.load %arg2[%c0_3, %c0_4] : memref<64x1xf32, #tpu.memory_space<vmem>>, vector<64x1xf32>
    %c0_5 = arith.constant 0 : index
    %c0_6 = arith.constant 0 : index
    %4 = vector.load %arg4[%c0_5, %c0_6] : memref<64x128xf32, #tpu.memory_space<vmem>>, vector<64x128xf32>
    %5 = vector.broadcast %3 : vector<64x1xf32> to vector<64x128xf32>
    %6 = arith.addf %5, %4 : vector<64x128xf32>
    %cst_7 = arith.constant 2.000000e+00 : f32
    %7 = vector.broadcast %cst_7 : f32 to vector<64x128xf32>
    %8 = arith.mulf %7, %2 : vector<64x128xf32>
    %9 = arith.subf %6, %8 : vector<64x128xf32>
    %cst_8 = arith.constant 0.000000e+00 : f32
    %10 = vector.broadcast %cst_8 : f32 to vector<64x128xf32>
    %11 = arith.maximumf %9, %10 : vector<64x128xf32>
    %c0_9 = arith.constant 0 : index
    %c0_10 = arith.constant 0 : index
    %12 = vector.load %arg3[%c0_9, %c0_10] : memref<64x1xf32, #tpu.memory_space<vmem>>, vector<64x1xf32>
    %cst_11 = arith.constant -5.000000e-01 : f32
    %13 = vector.broadcast %cst_11 : f32 to vector<64x128xf32>
    %14 = arith.mulf %13, %11 : vector<64x128xf32>
    %15 = math.exp %14 : vector<64x128xf32>
    %16 = vector.broadcast %12 : vector<64x1xf32> to vector<64x128xf32>
    %17 = arith.mulf %16, %15 : vector<64x128xf32>
    %c0_12 = arith.constant 0 : index
    %c0_13 = arith.constant 0 : index
    %18 = vector.load %arg5[%c0_12, %c0_13] : memref<64x64xf32, #tpu.memory_space<vmem>>, vector<64x64xf32>
    %cst_14 = arith.constant dense<0.000000e+00> : vector<64x128xf32>
    %19 = tpu.matmul %18, %17, %cst_14 {dimension_numbers = #tpu.dot_dimension_numbers<[1], [0], [0], [1], [0, 0, 1, 1], [], []>} : vector<64x64xf32>, vector<64x128xf32>, vector<64x128xf32> -> vector<64x128xf32>
    %c0_15 = arith.constant 0 : index
    %c0_16 = arith.constant 0 : index
    %20 = vector.load %arg6[%c0_15, %c0_16] : memref<64x64xf32, #tpu.memory_space<vmem>>, vector<64x64xf32>
    %cst_17 = arith.constant dense<0.000000e+00> : vector<64x128xf32>
    %21 = tpu.matmul %20, %19, %cst_17 {dimension_numbers = #tpu.dot_dimension_numbers<[1], [0], [0], [1], [0, 0, 1, 1], [], []>} : vector<64x64xf32>, vector<64x128xf32>, vector<64x128xf32> -> vector<64x128xf32>
    %c0_18 = arith.constant 0 : index
    %c0_19 = arith.constant 0 : index
    %22 = vector.load %arg7[%c0_18, %c0_19] : memref<8x64xf32, #tpu.memory_space<vmem>>, vector<8x64xf32>
    %cst_20 = arith.constant dense<0.000000e+00> : vector<8x128xf32>
    %23 = tpu.matmul %22, %19, %cst_20 {dimension_numbers = #tpu.dot_dimension_numbers<[1], [0], [0], [1], [0, 0, 1, 1], [], []>} : vector<8x64xf32>, vector<64x128xf32>, vector<8x128xf32> -> vector<8x128xf32>
    %c0_21 = arith.constant 0 : index
    %c0_22 = arith.constant 0 : index
    %24 = vector.load %arg10[%c0_21, %c0_22] : memref<8x128xf32, #tpu.memory_space<vmem>>, vector<8x128xf32>
    tpu.vector_store %arg10[%c0_21, %c0_22], %23 {strides = array<i32>} : memref<8x128xf32, #tpu.memory_space<vmem>>, vector<8x128xf32>,
    %c0_23 = arith.constant 0 : index
    %c0_24 = arith.constant 0 : index
    %25 = vector.load %arg8[%c0_23, %c0_24] : memref<8x64xf32, #tpu.memory_space<vmem>>, vector<8x64xf32>
    %26 = arith.mulf %19, %19 : vector<64x128xf32>
    %cst_25 = arith.constant dense<0.000000e+00> : vector<8x128xf32>
    %27 = tpu.matmul %25, %26, %cst_25 {dimension_numbers = #tpu.dot_dimension_numbers<[1], [0], [0], [1], [0, 0, 1, 1], [], []>} : vector<8x64xf32>, vector<64x128xf32>, vector<8x128xf32> -> vector<8x128xf32>
    %c0_26 = arith.constant 0 : index
    %c0_27 = arith.constant 0 : index
    %28 = vector.load %arg8[%c0_26, %c0_27] : memref<8x64xf32, #tpu.memory_space<vmem>>, vector<8x64xf32>
    %29 = arith.mulf %21, %21 : vector<64x128xf32>
    %cst_28 = arith.constant dense<0.000000e+00> : vector<8x128xf32>
    %30 = tpu.matmul %28, %29, %cst_28 {dimension_numbers = #tpu.dot_dimension_numbers<[1], [0], [0], [1], [0, 0, 1, 1], [], []>} : vector<8x64xf32>, vector<64x128xf32>, vector<8x128xf32> -> vector<8x128xf32>
    %c0_29 = arith.constant 0 : index
    %c0_30 = arith.constant 0 : index
    %31 = vector.load %arg9[%c0_29, %c0_30] : memref<8x1xf32, #tpu.memory_space<vmem>>, vector<8x1xf32>
    %32 = vector.broadcast %31 : vector<8x1xf32> to vector<8x128xf32>
    %33 = arith.subf %32, %27 : vector<8x128xf32>
    %34 = arith.addf %33, %30 : vector<8x128xf32>
    %c0_31 = arith.constant 0 : index
    %c0_32 = arith.constant 0 : index
    %35 = vector.load %arg11[%c0_31, %c0_32] : memref<8x128xf32, #tpu.memory_space<vmem>>, vector<8x128xf32>
    tpu.vector_store %arg11[%c0_31, %c0_32], %34 {strides = array<i32>} : memref<8x128xf32, #tpu.memory_space<vmem>>, vector<8x128xf32>,
    return
  }
}

</mosaic_0001>

<bundles_post_ra>
// kernel: integer_pow.0
= control target key start
LH: loop header
LB: loop body
LE: loop exit
PB: predicated region body
PF: predicated region fallthrough
CT: control target
= control target key end

     0   :  { %3 = vsyncpa [#allocation1], 0  ;;  %s176_s0 = inlined_call_operand.hbm [shape: f32[4,8,16], index: 0, kind: input, shape index: {}, may-alias: {0,1}]   ;;  %s177_s1 = inlined_call_operand.hbm [shape: f32[4,8,16], index: 1, kind: input, shape index: {}, may-alias: {0,1}]   ;;  %s178_s2 = inlined_call_operand.vmem [shape: f32[4,8,16], index: 2, kind: output, shape index: {}]  }
   0x1   :  { %4 = vsyncpa [#allocation3], 0  ;;  %s121_s9 = smov [#allocation0]   ;;  %s73_s13 = scalar_lea.hbm %s176_s0, 512 }
   0x2   :  { %s8_s10 = sshll.u32 %s121_s9, 4  ;;  %p74_p0 = scmp.ne.s32.totalorder %s176_s0, %s73_s13  ;;  %s9_s10 = int_to_ptr.vmem [resolvable:$true] %s8_s10 }
   0x3   :  { %p77_p1 = scmp.lt.u32.totalorder %s73_s13, %s176_s0 }
   0x5   :  { %p79_p2 = pnand %p77_p1, %p74_p0 }
   0x7   :  { %82 = shalt.err (!%p79_p2)
}
   0x8   :  { %s83_s18 = scalar_lea.vmem %s9_s10, 512  ;;  %p88_p4 = scmp.lt.s32.totalorder %s9_s10, %s9_s10 }
   0x9   :  { %p84_p3 = scmp.ne.s32.totalorder %s9_s10, %s83_s18  ;;  %p89_p5 = scmp.lt.s32.totalorder %s83_s18, %s83_s18 }
   0xb   :  { %p90_p6 = por %p89_p5, %p88_p4 }
   0xd   :  { %p91_p7 = pnand %p90_p6, %p84_p3 }
   0xf   :  { %94 = shalt.err (!%p91_p7)
}
  0x10   :  { %s122_s19 = smov 128   ;;  %s123_s20 = smov 8  }
  0x11   :  { %14 = dma.hbm_to_vmem [thread:$0]  %s176_s0, 512, %s9_s10, [#allocation1], %s122_s19, %s122_s19, %s123_s20  }
  0x12   :  { %s124_s0 = smov [#allocation2]   ;;  %s95_s26 = scalar_lea.hbm %s177_s1, 512 }
  0x13   :  { %s18_s23 = sshll.u32 %s124_s0, 4  ;;  %p96_p8 = scmp.ne.s32.totalorder %s177_s1, %s95_s26  ;;  %s19_s23 = int_to_ptr.vmem [resolvable:$true] %s18_s23 }
  0x14   :  { %p99_p9 = scmp.lt.u32.totalorder %s95_s26, %s177_s1 }
  0x16   :  { %p101_p10 = pnand %p99_p9, %p96_p8 }
  0x18   :  { %104 = shalt.err (!%p101_p10)
}
  0x19   :  { %s105_s3 = scalar_lea.vmem %s19_s23, 512  ;;  %p110_p12 = scmp.lt.s32.totalorder %s19_s23, %s19_s23 }
  0x1a   :  { %p106_p11 = scmp.ne.s32.totalorder %s19_s23, %s105_s3  ;;  %p111_p13 = scmp.lt.s32.totalorder %s105_s3, %s105_s3 }
  0x1c   :  { %p112_p0 = por %p111_p13, %p110_p12 }
  0x1e   :  { %p113_p1 = pnand %p112_p0, %p106_p11 }
  0x20   :  { %116 = shalt.err (!%p113_p1)
}
  0x21   :  { %24 = dma.hbm_to_vmem [thread:$0]  %s177_s1, 512, %s19_s23, [#allocation3], %s122_s19, %s122_s19, %s123_s20  }
  0x22   :  { %117 = dma.done.wait [#allocation1], 512  }
  0x23   :  { %118 = vsyncadd [#allocation1], 4294966784 }
  0x24   :  { %119 = dma.done.wait [#allocation3], 512  }
  0x25   :  { %120 = vsyncadd [#allocation3], 4294966784  ;;  %v27_v0 = vld [vmem:[#allocation0] sm:$0xff]  ;;  %v35_v2 = vld [vmem:[#allocation0 + $0x8] sm:$0xff] }
  0x26   :  { %v28_v1 = vld [vmem:[#allocation2] sm:$0xff]  ;;  %v37_v4 = vld [vmem:[#allocation2 + $0x8] sm:$0xff]  ;;  %v45_v5 = vld [vmem:[#allocation0 + $0x10] sm:$0xff] }
  0x27   :  { %v31_v3 = vmul.f32 %v28_v1, %v27_v0  ;;  %v47_v6 = vld [vmem:[#allocation2 + $0x10] sm:$0xff]  ;;  %v40_v7 = vmul.f32 %v37_v4, %v35_v2  ;;  %v55_v9 = vld [vmem:[#allocation0 + $0x18] sm:$0xff] }
  0x28   :  { %v50_v8 = vmul.f32 %v47_v6, %v45_v5  ;;  %v57_v10 = vld [vmem:[#allocation2 + $0x18] sm:$0xff] }
  0x29   :  { %33 = vst [vmem:[%s178_s2] sm:$0xff] %v31_v3  ;;  %v60_v11 = vmul.f32 %v57_v10, %v55_v9  ;;  %66 = vst [vmem:[%s178_s2 + $0x8] sm:$0xff] %v40_v7 }
  0x2a   :  { %67 = vst [vmem:[%s178_s2 + $0x10] sm:$0xff] %v50_v8 }
  0x2b   :  { %68 = vst [vmem:[%s178_s2 + $0x18] sm:$0xff] %v60_v11 }
  0x2c   :  { %64 = vsyncpa [#allocation1], 1 }
  0x2d   :  { %65 = vsyncpa [#allocation3], 1 }

// kernel: custom-call.4
= control target key start
LH: loop header
LB: loop body
LE: loop exit
PB: predicated region body
PF: predicated region fallthrough
CT: control target
= control target key end

     0   :  { %s524_s6 = smov 0   ;;  %s526_s7 = smov 0   ;;  %s626_s0 = inlined_call_operand.vmem [shape: f32[2,4,8,8], index: 0, kind: input, shape index: {}]   ;;  %s627_s1 = inlined_call_operand.vmem [shape: f32[2,4,8,8], index: 1, kind: output, shape index: {}]  }
   0x1   :  { %s528_s8 = smov 0   ;;  %s530_s9 = smov 0  }
   0x2   :  { %s532_s10 = smov 0  }
   0x3 LB: > { %s388_s11 = sadd.s32 4294967295, %s511_s10   ;;  %s29_s12 = sadd.s32 1, %s503_s8  ;;  %s511_s10 = sphi %s532_s10, %s7_s10   ;;  %s507_s9 = sphi %s530_s9, %s631_s9   ;;  %s503_s8 = sphi %s528_s8, %s630_s8   ;;  %s499_s7 = sphi %s526_s7, %s629_s7   ;;  %s495_s6 = sphi %s524_s6, %s628_s6  }
   0x4   : > { %p31_p0 = scmp.ge.s32.totalorder %s29_s12, 4  ;;  %s33_s13 = sadd.s32 1, %s507_s9 }
   0x5   : > { %p390_p2 = scmp.ge.s32.totalorder %s511_s10, 8 }
   0x6   : > { %s633_s12 = smov (%p31_p0, %s29_s12), 0  ;;  %s635_s13 = smov (!%p31_p0, %s33_s13), %s507_s9 }
   0x7   : > { %p35_p1 = scmp.ge.s32.totalorder %s635_s13, 2  ;;  %47 = sbr.rel (%p390_p2) target bundleno = 15 (0xf), region = 16 }
   0x8   : > { %s49_s14 = sand.u32 (!%p390_p2), 1, %s511_s10   ;;  %s392_s15 = sshll.u32 (!%p390_p2), %s507_s9, 2 }
   0x9   : > { %s637_s13 = smov (%p35_p1, %s635_s13), 0  ;;  %s391_s16 = sshll.u32 (!%p390_p2), %s49_s14, 3 }
   0xa   : > { %s55_s17 = sadd.s32 (!%p390_p2), %s503_s8, %s392_s15  ;;  %s51_s22 = scalar_lea.vmem (!%p390_p2), [#allocation0], %s391_s16 }
   0xb   : > { %s393_s18 = sshll.u32 (!%p390_p2), %s55_s17, 3 }
   0xc   : > { %s57_s21 = scalar_lea.vmem (!%p390_p2), %s626_s0, %s393_s18 }
   0xd   : > { %v85_v0 = vld [vmem:[%s57_s21] sm:$0xff] (!%p390_p2) }
   0xe   : > { %86 = vst [vmem:[%s51_s22] sm:$0xff] %v85_v0 }
   0xf PF: > { %p394_p3 = scmp.ge.s32.totalorder %s511_s10, 1  ;;  %p91_p4 = scmp.lt.s32.totalorder %s511_s10, 9 }
  0x11   : > { %p92_p5 = pnand %p394_p3, %p91_p4 }
  0x12   : > { %s98_s23 = sand.u32 (!%p92_p5), 1, %s388_s11   ;;  %v513_v1 = vmov (!%p92_p5), 0.0   ;;  %vm110_vm0 = vcmask (!%p92_p5), 7168   ;;  %vm128_vm1 = vcmask (!%p92_p5), 15368   ;;  %vm145_vm2 = vcmask (!%p92_p5), 1047553   ;;  %s412_s27 = sshll.u32 (!%p92_p5), %s499_s7, 2 }
  0x13   : > { %95 = sbr.rel (%p92_p5) target bundleno = 1380 (0x564), region = 54  ;;  %s395_s24 = sshll.u32 (!%p92_p5), %s98_s23, 3  ;;  %vm146_vm3 = vmand (!%p92_p5), %vm128_vm1, %vm145_vm2  ;;  %vm150_vm4 = vcmask (!%p92_p5), 23568   ;;  %vm167_vm5 = vcmask (!%p92_p5), 1047554   ;;  %vm172_vm7 = vcmask (!%p92_p5), 31768   ;;  %vm189_vm8 = vcmask (!%p92_p5), 1047555  }
  0x14   : > { %s566_s25 = scalar_lea.vmem (!%p92_p5), [#allocation1], %s395_s24  ;;  %s570_s26 = scalar_lea.vmem (!%p92_p5), [#allocation0], %s395_s24  ;;  %vm168_vm6 = vmand (!%p92_p5), %vm150_vm4, %vm167_vm5  ;;  %vm194_vm10 = vcmask (!%p92_p5), 39968   ;;  %vm211_vm11 = vcmask (!%p92_p5), 1047556   ;;  %vm216_vm13 = vcmask (!%p92_p5), 48168   ;;  %vm233_vm14 = vcmask (!%p92_p5), 1047557  }
  0x15   : > { %109 = vst [vmem:[%s566_s25] sm:$0xff] (!%p92_p5), %v513_v1  ;;  %v112_v5 = vld [vmem:[%s570_s26] ss:$0 sm:$0xff] (!%p92_p5)  ;;  %v398_v17 = vld [vmem:[%s570_s26 + $0x1] ss:$0 sm:$0xff] (!%p92_p5)  ;;  %v400_v29 = vld [vmem:[%s570_s26 + $0x2] ss:$0 sm:$0xff] (!%p92_p5)  ;;  %s289_s28 = sadd.s32 (!%p92_p5), %s495_s6, %s412_s27 }
  0x16   : > { %v574_v9 = vld [vmem:[%s570_s26] sm:$0xff] (!%p92_p5)  ;;  %vm190_vm9 = vmand (!%p92_p5), %vm172_vm7, %vm189_vm8  ;;  %vm255_vm1 = vcmask (!%p92_p5), 1047558   ;;  %vm277_vm4 = vcmask (!%p92_p5), 1047559   ;;  %s413_s29 = sshll.u32 (!%p92_p5), %s289_s28, 3 }
  0x17   : > { %v402_v41 = vld [vmem:[%s570_s26 + $0x3] ss:$0 sm:$0xff] (!%p92_p5)  ;;  %v404_v53 = vld [vmem:[%s570_s26 + $0x4] ss:$0 sm:$0xff] (!%p92_p5)  ;;  %vm212_vm12 = vmand (!%p92_p5), %vm194_vm10, %vm211_vm11  ;;  %s291_s3 = scalar_lea.vmem (!%p92_p5), %s627_s1, %s413_s29 }
  0x18   : > { %v406_v1 = vld [vmem:[%s570_s26 + $0x5] ss:$0 sm:$0xff] (!%p92_p5)  ;;  %vm234_vm15 = vmand (!%p92_p5), %vm216_vm13, %vm233_vm14 }
  0x1c   : > { %v111_v2 = vld [vmem:[%s566_s25] ss:$0 sm:$0xff] }
  0x1d   : > { %v113_v3 = vmul.f32 %v111_v2, %v111_v2  ;;  %v120_v4 = vmul.f32 0.0, %v111_v2 }
  0x1f   : > { %114 = vadd.xlane.f32.xlu0 %v113_v3 }
  0x23   : > { %121 = vadd.xlane.f32.xlu0 %v120_v4 }
  0xac   : > { %v115_v6 = vpop.xlane.xlu0 %114 }
  0xad   : > { %v116_v7 = vsub.f32 %v112_v5, %v115_v6 }
  0xaf   : > { %457 = vrsqrt.f32 %v116_v7 }
  0xb0   : > { %v122_v8 = vpop.xlane.xlu0 %121 }
  0xb1   : > { %v123_v10 = vsub.f32 %v574_v9, %v122_v8 }
  0xb9   : > { %v458_v11 = vpop.eup %457 }
  0xba   : > { %v124_v12 = vmul.f32 %v458_v11, %v123_v10 }
  0xbc   : > { %v125_v13 = vsel %vm110_vm0, %v124_v12, 0.0  ;;  %vm238_vm0 = vcmask 56368  }
  0xbd   : > { %127 = vst [vmem:[%s566_s25] sm:$0xff] %v125_v13  ;;  %vm256_vm2 = vmand %vm238_vm0, %vm255_vm1 }
  0xc4   : > { %v397_v14 = vld [vmem:[%s566_s25 + $0x1] ss:$0 sm:$0xff] }
  0xc5   : > { %v133_v15 = vmul.f32 %v397_v14, %v397_v14  ;;  %v140_v16 = vmul.f32 %v397_v14, %v125_v13  ;;  %v408_v14 = vld [vmem:[%s570_s26 + $0x6] ss:$0 sm:$0xff] }
  0xc7   : > { %134 = vadd.xlane.f32.xlu1 %v133_v15 }
  0xcb   : > { %141 = vadd.xlane.f32.xlu1 %v140_v16 }
 0x154   : > { %v135_v18 = vpop.xlane.xlu1 %134 }
 0x155   : > { %v136_v19 = vsub.f32 %v398_v17, %v135_v18 }
 0x157   : > { %459 = vrsqrt.f32 %v136_v19 }
 0x158   : > { %v142_v20 = vpop.xlane.xlu1 %141 }
 0x159   : > { %v143_v21 = vsub.f32 %v574_v9, %v142_v20 }
 0x161   : > { %v460_v22 = vpop.eup %459 }
 0x162   : > { %v144_v23 = vmul.f32 %v460_v22, %v143_v21 }
 0x164   : > { %v147_v24 = vsel %vm146_vm3, %v144_v23, 0.0  ;;  %vm260_vm3 = vcmask 64568  }
 0x165   : > { %v148_v25 = vadd.f32 %v147_v24, %v125_v13  ;;  %vm278_vm5 = vmand %vm260_vm3, %vm277_vm4 }
 0x167   : > { %149 = vst [vmem:[%s566_s25] sm:$0xff] %v148_v25 }
 0x16e   : > { %v399_v26 = vld [vmem:[%s566_s25 + $0x2] ss:$0 sm:$0xff] }
 0x16f   : > { %v162_v27 = vmul.f32 %v399_v26, %v148_v25  ;;  %v155_v28 = vmul.f32 %v399_v26, %v399_v26  ;;  %v410_v26 = vld [vmem:[%s570_s26 + $0x7] ss:$0 sm:$0xff] }
 0x171   : > { %163 = vadd.xlane.f32.xlu1 %v162_v27  ;;  %156 = vadd.xlane.f32.xlu0 %v155_v28 }
 0x1fe   : > { %v157_v30 = vpop.xlane.xlu0 %156  ;;  %v164_v32 = vpop.xlane.xlu1 %163 }
 0x1ff   : > { %v158_v31 = vsub.f32 %v400_v29, %v157_v30  ;;  %v165_v33 = vsub.f32 %v574_v9, %v164_v32 }
 0x201   : > { %461 = vrsqrt.f32 %v158_v31 }
 0x20b   : > { %v462_v34 = vpop.eup %461 }
 0x20c   : > { %v166_v35 = vmul.f32 %v462_v34, %v165_v33 }
 0x20e   : > { %v169_v36 = vsel %vm168_vm6, %v166_v35, 0.0 }
 0x20f   : > { %v170_v37 = vadd.f32 %v169_v36, %v148_v25 }
 0x211   : > { %171 = vst [vmem:[%s566_s25] sm:$0xff] %v170_v37 }
 0x218   : > { %v401_v38 = vld [vmem:[%s566_s25 + $0x3] ss:$0 sm:$0xff] }
 0x219   : > { %v184_v39 = vmul.f32 %v401_v38, %v170_v37  ;;  %v177_v40 = vmul.f32 %v401_v38, %v401_v38 }
 0x21b   : > { %185 = vadd.xlane.f32.xlu1 %v184_v39  ;;  %178 = vadd.xlane.f32.xlu0 %v177_v40 }
 0x2a8   : > { %v179_v42 = vpop.xlane.xlu0 %178  ;;  %v186_v44 = vpop.xlane.xlu1 %185 }
 0x2a9   : > { %v180_v43 = vsub.f32 %v402_v41, %v179_v42  ;;  %v187_v45 = vsub.f32 %v574_v9, %v186_v44 }
 0x2ab   : > { %463 = vrsqrt.f32 %v180_v43 }
 0x2b5   : > { %v464_v46 = vpop.eup %463 }
 0x2b6   : > { %v188_v47 = vmul.f32 %v464_v46, %v187_v45 }
 0x2b8   : > { %v191_v48 = vsel %vm190_vm9, %v188_v47, 0.0 }
 0x2b9   : > { %v192_v49 = vadd.f32 %v191_v48, %v170_v37 }
 0x2bb   : > { %193 = vst [vmem:[%s566_s25] sm:$0xff] %v192_v49 }
 0x2c2   : > { %v403_v50 = vld [vmem:[%s566_s25 + $0x4] ss:$0 sm:$0xff] }
 0x2c3   : > { %v206_v51 = vmul.f32 %v403_v50, %v192_v49  ;;  %v199_v52 = vmul.f32 %v403_v50, %v403_v50 }
 0x2c5   : > { %207 = vadd.xlane.f32.xlu1 %v206_v51  ;;  %200 = vadd.xlane.f32.xlu0 %v199_v52 }
 0x352   : > { %v201_v54 = vpop.xlane.xlu0 %200  ;;  %v208_v56 = vpop.xlane.xlu1 %207 }
 0x353   : > { %v202_v55 = vsub.f32 %v404_v53, %v201_v54  ;;  %v209_v57 = vsub.f32 %v574_v9, %v208_v56 }
 0x355   : > { %465 = vrsqrt.f32 %v202_v55 }
 0x35f   : > { %v466_v58 = vpop.eup %465 }
 0x360   : > { %v210_v59 = vmul.f32 %v466_v58, %v209_v57 }
 0x362   : > { %v213_v60 = vsel %vm212_vm12, %v210_v59, 0.0 }
 0x363   : > { %v214_v61 = vadd.f32 %v213_v60, %v192_v49 }
 0x365   : > { %215 = vst [vmem:[%s566_s25] sm:$0xff] %v214_v61 }
 0x36c   : > { %v405_v62 = vld [vmem:[%s566_s25 + $0x5] ss:$0 sm:$0xff] }
 0x36d   : > { %v228_v63 = vmul.f32 %v405_v62, %v214_v61  ;;  %v221_v0 = vmul.f32 %v405_v62, %v405_v62 }
 0x36f   : > { %229 = vadd.xlane.f32.xlu1 %v228_v63  ;;  %222 = vadd.xlane.f32.xlu0 %v221_v0 }
 0x3fc   : > { %v223_v2 = vpop.xlane.xlu0 %222  ;;  %v230_v4 = vpop.xlane.xlu1 %229 }
 0x3fd   : > { %v224_v3 = vsub.f32 %v406_v1, %v223_v2  ;;  %v231_v5 = vsub.f32 %v574_v9, %v230_v4 }
 0x3ff   : > { %467 = vrsqrt.f32 %v224_v3 }
 0x409   : > { %v468_v6 = vpop.eup %467 }
 0x40a   : > { %v232_v7 = vmul.f32 %v468_v6, %v231_v5 }
 0x40c   : > { %v235_v8 = vsel %vm234_vm15, %v232_v7, 0.0 }
 0x40d   : > { %v236_v10 = vadd.f32 %v235_v8, %v214_v61 }
 0x40f   : > { %237 = vst [vmem:[%s566_s25] sm:$0xff] %v236_v10 }
 0x416   : > { %v407_v11 = vld [vmem:[%s566_s25 + $0x6] ss:$0 sm:$0xff] }
 0x417   : > { %v250_v12 = vmul.f32 %v407_v11, %v236_v10  ;;  %v243_v13 = vmul.f32 %v407_v11, %v407_v11 }
 0x419   : > { %251 = vadd.xlane.f32.xlu1 %v250_v12  ;;  %244 = vadd.xlane.f32.xlu0 %v243_v13 }
 0x4a6   : > { %v245_v15 = vpop.xlane.xlu0 %244  ;;  %v252_v17 = vpop.xlane.xlu1 %251 }
 0x4a7   : > { %v246_v16 = vsub.f32 %v408_v14, %v245_v15  ;;  %v253_v18 = vsub.f32 %v574_v9, %v252_v17 }
 0x4a9   : > { %469 = vrsqrt.f32 %v246_v16 }
 0x4b3   : > { %v470_v19 = vpop.eup %469 }
 0x4b4   : > { %v254_v20 = vmul.f32 %v470_v19, %v253_v18 }
 0x4b6   : > { %v257_v21 = vsel %vm256_vm2, %v254_v20, 0.0 }
 0x4b7   : > { %v258_v22 = vadd.f32 %v257_v21, %v236_v10 }
 0x4b9   : > { %259 = vst [vmem:[%s566_s25] sm:$0xff] %v258_v22 }
 0x4c0   : > { %v409_v23 = vld [vmem:[%s566_s25 + $0x7] ss:$0 sm:$0xff] }
 0x4c1   : > { %v272_v24 = vmul.f32 %v409_v23, %v258_v22  ;;  %v265_v25 = vmul.f32 %v409_v23, %v409_v23 }
 0x4c3   : > { %273 = vadd.xlane.f32.xlu1 %v272_v24  ;;  %266 = vadd.xlane.f32.xlu0 %v265_v25 }
 0x550   : > { %v267_v27 = vpop.xlane.xlu0 %266  ;;  %v274_v29 = vpop.xlane.xlu1 %273 }
 0x551   : > { %v268_v28 = vsub.f32 %v410_v26, %v267_v27  ;;  %v275_v30 = vsub.f32 %v574_v9, %v274_v29 }
 0x553   : > { %471 = vrsqrt.f32 %v268_v28 }
 0x55d   : > { %v472_v31 = vpop.eup %471 }
 0x55e   : > { %v276_v32 = vmul.f32 %v472_v31, %v275_v30 }
 0x560   : > { %v279_v33 = vsel %vm278_vm5, %v276_v32, 0.0 }
 0x561   : > { %v280_v34 = vadd.f32 %v279_v33, %v258_v22 }
 0x563   : > { %281 = vst [vmem:[%s566_s25] sm:$0xff] %v280_v34  ;;  %320 = vst [vmem:[%s291_s3] sm:$0xff] %v280_v34 }
 0x564 PF: > { %s7_s10 = sadd.s32 1, %s511_s10   ;;  %s628_s6 = smov %s503_s8 }
 0x565   : > { %p4_p6 = scmp.ge.s32.totalorder %s7_s10, 10   ;;  %s629_s7 = smov %s507_s9 }
 0x566   : > { %s630_s8 = smov %s633_s12  ;;  %s631_s9 = smov %s637_s13 }
 0x567   :  { %6 = sbr.rel (!%p4_p6) target bundleno = 3 (0x3), region = 132 }

// kernel: custom-call.5
= control target key start
LH: loop header
LB: loop body
LE: loop exit
PB: predicated region body
PF: predicated region fallthrough
CT: control target
= control target key end

     0   :  { %s440_s6 = smov 0   ;;  %s442_s7 = smov 0   ;;  %s520_s0 = inlined_call_operand.vmem [shape: f32[2,4,1,8,8], index: 0, kind: input, shape index: {}]   ;;  %s521_s1 = inlined_call_operand.vmem [shape: f32[2,4,1,8,8], index: 1, kind: output, shape index: {}]  }
   0x1   :  { %s444_s8 = smov 0   ;;  %s446_s9 = smov 0  }
   0x2   :  { %s448_s10 = smov 0  }
   0x3 LB: > { %s332_s11 = sadd.s32 4294967295, %s427_s10   ;;  %s36_s12 = sadd.s32 1, %s419_s8  ;;  %s427_s10 = sphi %s448_s10, %s7_s10   ;;  %s423_s9 = sphi %s446_s9, %s525_s9   ;;  %s419_s8 = sphi %s444_s8, %s524_s8   ;;  %s415_s7 = sphi %s442_s7, %s523_s7   ;;  %s411_s6 = sphi %s440_s6, %s522_s6  }
   0x4   : > { %p38_p0 = scmp.ge.s32.totalorder %s36_s12, 4  ;;  %s40_s13 = sadd.s32 1, %s423_s9 }
   0x5   : > { %p334_p2 = scmp.ge.s32.totalorder %s427_s10, 8 }
   0x6   : > { %s527_s12 = smov (%p38_p0, %s36_s12), 0  ;;  %s529_s13 = smov (!%p38_p0, %s40_s13), %s423_s9 }
   0x7   : > { %p42_p1 = scmp.ge.s32.totalorder %s529_s13, 2  ;;  %54 = sbr.rel (%p334_p2) target bundleno = 15 (0xf), region = 16 }
   0x8   : > { %s56_s14 = sand.u32 (!%p334_p2), 1, %s427_s10   ;;  %s336_s15 = sshll.u32 (!%p334_p2), %s423_s9, 2 }
   0x9   : > { %s531_s13 = smov (%p42_p1, %s529_s13), 0  ;;  %s335_s16 = sshll.u32 (!%p334_p2), %s56_s14, 3 }
   0xa   : > { %s63_s17 = sadd.s32 (!%p334_p2), %s419_s8, %s336_s15  ;;  %s58_s22 = scalar_lea.vmem (!%p334_p2), [#allocation0], %s335_s16 }
   0xb   : > { %s337_s18 = sshll.u32 (!%p334_p2), %s63_s17, 3 }
   0xc   : > { %s65_s21 = scalar_lea.vmem (!%p334_p2), %s520_s0, %s337_s18 }
   0xd   : > { %v93_v0 = vld [vmem:[%s65_s21] sm:$0xff] (!%p334_p2) }
   0xe   : > { %94 = vst [vmem:[%s58_s22] sm:$0xff] %v93_v0 }
   0xf PF: > { %p338_p3 = scmp.ge.s32.totalorder %s427_s10, 1  ;;  %p99_p4 = scmp.lt.s32.totalorder %s427_s10, 9 }
  0x11   : > { %p100_p5 = pnand %p338_p3, %p99_p4 }
  0x13   : > { %103 = sbr.rel (%p100_p5) target bundleno = 1216 (0x4c0), region = 54 }
  0x1a   : > { %s106_s23 = sand.u32 1, %s332_s11   ;;  %v117_v1 = vlaneseq  ;;  %v429_v10 = vmov -1.0   ;;  %s342_s26 = sshll.u32 %s415_s7, 2 }
  0x1b   : > { %s339_s24 = sshll.u32 %s106_s23, 3  ;;  %s228_s27 = sadd.s32 %s411_s6, %s342_s26 }
  0x1c   : > { %v482_v2 = vand.u32 127, %v117_v1  ;;  %v121_v3 = vshrl.u32 %v117_v1, 7  ;;  %s108_s25 = scalar_lea.vmem [#allocation0], %s339_s24  ;;  %s343_s28 = sshll.u32 %s228_s27, 3 }
  0x1d   : > { %v124_v4 = vld [vmem:[%s108_s25] sm:$0xff]  ;;  %s230_s2 = scalar_lea.vmem %s521_s1, %s343_s28 }
  0x1e   : > { %vm119_vm0 = vcmp.lt.s32.totalorder %v482_v2, 8  ;;  %vm123_vm1 = vcmp.eq.s32.totalorder %v121_v3, %v482_v2  ;;  %vm128_vm2 = vcmp.ge.s32.totalorder %v121_v3, %v482_v2  ;;  %vm142_vm4 = vcmp.eq.s32.totalorder %v482_v2, 0 }
  0x1f   : > { %v125_v5 = vsel %vm123_vm1, %v124_v4, 0.0  ;;  %vm129_vm3 = vmand %vm128_vm2, %vm119_vm0  ;;  %vm139_vm5 = vcmp.eq.s32.totalorder %v482_v2, %v121_v3  ;;  %v143_v11 = vsel %vm142_vm4, 1.0, %v429_v10  ;;  %vm150_vm6 = vcmp.eq.s32.totalorder %v482_v2, 1 }
  0x20   : > { %v130_v6 = vsel %vm129_vm3, %v124_v4, 0.0  ;;  %126 = vadd.xlane.f32.xlu0 %v125_v5  ;;  %v144_v12 = vsel %vm139_vm5, %v143_v11, 0.0  ;;  %vm160_vm7 = vcmp.eq.s32.totalorder %v482_v2, 2  ;;  %vm170_vm8 = vcmp.eq.s32.totalorder %v482_v2, 3 }
  0x21   : > { %vm180_vm9 = vcmp.eq.s32.totalorder %v482_v2, 4  ;;  %vm190_vm10 = vcmp.eq.s32.totalorder %v482_v2, 5  ;;  %vm200_vm11 = vcmp.eq.s32.totalorder %v482_v2, 6  ;;  %vm210_vm12 = vcmp.eq.s32.totalorder %v482_v2, 7 }
  0xad   : > { %v487_v7 = vpop.xlane.xlu0 %126 }
  0xae   : > { %387 = vrcp.f32 %v487_v7  ;;  %vm217_vm13 = vweird.f32 %v487_v7 }
  0xb8   : > { %v388_v8 = vpop.eup %387 }
  0xb9   : > { %v132_v9 = vmul.f32 %v388_v8, %v130_v6 }
  0xbb   : > { %133 = vst [vmem:[#allocation2] sm:$0xff] %v132_v9 }
  0xc2   : > { %v146_v13 = vld [vmem:[#allocation2 + $0x1] ss:$0 sm:$0xff]  ;;  %v156_v16 = vld [vmem:[#allocation2 + $0x2] ss:$0 sm:$0xff]  ;;  %v166_v21 = vld [vmem:[#allocation2 + $0x3] ss:$0 sm:$0xff] }
  0xc3   : > { %v147_v14 = vxor.u32 2147483648, %v146_v13  ;;  %v157_v18 = vxor.u32 2147483648, %v156_v16  ;;  %v167_v23 = vxor.u32 2147483648, %v166_v21  ;;  %v176_v26 = vld [vmem:[#allocation2 + $0x4] ss:$0 sm:$0xff] }
  0xc4   : > { %v177_v28 = vxor.u32 2147483648, %v176_v26  ;;  %v186_v31 = vld [vmem:[#allocation2 + $0x5] ss:$0 sm:$0xff]  ;;  %v196_v36 = vld [vmem:[#allocation2 + $0x6] ss:$0 sm:$0xff] }
  0xc5   : > { %v151_v15 = vmul.f32 %v147_v14, %v144_v12  ;;  %v187_v33 = vxor.u32 2147483648, %v186_v31  ;;  %v197_v38 = vxor.u32 2147483648, %v196_v36  ;;  %v206_v41 = vld [vmem:[#allocation2 + $0x7] ss:$0 sm:$0xff] }
  0xc6   : > { %v207_v43 = vxor.u32 2147483648, %v206_v41 }
  0xc7   : > { %152 = vadd.xlane.f32.xlu0 %v151_v15 }
 0x154   : > { %v153_v17 = vpop.xlane.xlu0 %152 }
 0x155   : > { %v154_v19 = vsel %vm150_vm6, %v153_v17, %v144_v12 }
 0x156   : > { %v161_v20 = vmul.f32 %v157_v18, %v154_v19 }
 0x158   : > { %162 = vadd.xlane.f32.xlu1 %v161_v20 }
 0x1e5   : > { %v163_v22 = vpop.xlane.xlu1 %162 }
 0x1e6   : > { %v164_v24 = vsel %vm160_vm7, %v163_v22, %v154_v19 }
 0x1e7   : > { %v171_v25 = vmul.f32 %v167_v23, %v164_v24 }
 0x1e9   : > { %172 = vadd.xlane.f32.xlu1 %v171_v25 }
 0x276   : > { %v173_v27 = vpop.xlane.xlu1 %172 }
 0x277   : > { %v174_v29 = vsel %vm170_vm8, %v173_v27, %v164_v24 }
 0x278   : > { %v181_v30 = vmul.f32 %v177_v28, %v174_v29 }
 0x27a   : > { %182 = vadd.xlane.f32.xlu0 %v181_v30 }
 0x307   : > { %v183_v32 = vpop.xlane.xlu0 %182 }
 0x308   : > { %v184_v34 = vsel %vm180_vm9, %v183_v32, %v174_v29 }
 0x309   : > { %v191_v35 = vmul.f32 %v187_v33, %v184_v34 }
 0x30b   : > { %192 = vadd.xlane.f32.xlu1 %v191_v35 }
 0x398   : > { %v193_v37 = vpop.xlane.xlu1 %192 }
 0x399   : > { %v194_v39 = vsel %vm190_vm10, %v193_v37, %v184_v34 }
 0x39a   : > { %v201_v40 = vmul.f32 %v197_v38, %v194_v39 }
 0x39c   : > { %202 = vadd.xlane.f32.xlu0 %v201_v40 }
 0x429   : > { %v203_v42 = vpop.xlane.xlu0 %202 }
 0x42a   : > { %v204_v44 = vsel %vm200_vm11, %v203_v42, %v194_v39 }
 0x42b   : > { %v211_v45 = vmul.f32 %v207_v43, %v204_v44 }
 0x42d   : > { %212 = vadd.xlane.f32.xlu1 %v211_v45 }
 0x4ba   : > { %v213_v46 = vpop.xlane.xlu1 %212 }
 0x4bb   : > { %v214_v47 = vsel %vm210_vm12, %v213_v46, %v204_v44 }
 0x4bc   : > { %v216_v48 = vmul.f32 %v388_v8, %v214_v47 }
 0x4be   : > { %v218_v49 = vsel %vm217_vm13, %v214_v47, %v216_v48 }
 0x4bf   : > { %259 = vst [vmem:[%s230_s2] sm:$0xff] %v218_v49 }
 0x4c0 PF: > { %s7_s10 = sadd.s32 1, %s427_s10   ;;  %s522_s6 = smov %s419_s8 }
 0x4c1   : > { %p4_p6 = scmp.ge.s32.totalorder %s7_s10, 10   ;;  %s523_s7 = smov %s423_s9 }
 0x4c2   : > { %s524_s8 = smov %s527_s12  ;;  %s525_s9 = smov %s531_s13 }
 0x4c3   :  { %6 = sbr.rel (!%p4_p6) target bundleno = 3 (0x3), region = 125 }

// kernel: mul.4
= control target key start
LH: loop header
LB: loop body
LE: loop exit
PB: predicated region body
PF: predicated region fallthrough
CT: control target
= control target key end

     0   :  { %s34_s0 = inlined_call_operand.vmem [shape: f32[8,64], index: 0, kind: input, shape index: {}]   ;;  %s35_s1 = inlined_call_operand.vmem [shape: f32[8,64], index: 1, kind: input, shape index: {}]   ;;  %s36_s2 = inlined_call_operand.vmem [shape: f32[8,64], index: 2, kind: output, shape index: {}]  }
   0x1   :  { %v3_v0 = vld [vmem:[%s34_s0] sm:$0xff] }
   0x2   :  { %v4_v1 = vld [vmem:[%s35_s1] sm:$0xff] }
   0x3   :  { %v7_v2 = vmul.f32 %v4_v1, %v3_v0 }
   0x5   :  { %9 = vst [vmem:[%s36_s2] sm:$0xff] %v7_v2 }

// kernel: svgp_forward.1
= control target key start
LH: loop header
LB: loop body
LE: loop exit
PB: predicated region body
PF: predicated region fallthrough
CT: control target
= control target key end

     0   :  { %17 = vsyncpa [#allocation3], 0  ;;  %vm49_vm0 = vcmask 130048   ;;  %v1263_v4 = vmov 0   ;;  %s1557_s0 = inlined_call_operand.vmem [shape: f32[16,128], index: 0, kind: input, shape index: {}]   ;;  %s1558_s1 = inlined_call_operand.vmem [shape: f32[64,16], index: 1, kind: input, shape index: {}]   ;;  %s1559_s2 = inlined_call_operand.vmem [shape: f32[64,1], index: 2, kind: input, shape index: {}]   ;;  %s1560_s3 = inlined_call_operand.vmem [shape: f32[64,1], index: 3, kind: input, shape index: {}]   ;;  %s1561_s4 = inlined_call_operand.vmem [shape: f32[64,128], index: 4, kind: input, shape index: {}]   ;;  %s1562_s5 = inlined_call_operand.vmem [shape: f32[64,64], index: 5, kind: input, shape index: {}]   ;;  %s1563_s6 = inlined_call_operand.vmem [shape: f32[64,64], index: 6, kind: input, shape index: {}]   ;;  %s1564_s7 = inlined_call_operand.vmem [shape: f32[8,64], index: 7, kind: input, shape index: {}]   ;;  %s1565_s8 = inlined_call_operand.vmem [shape: f32[8,64], index: 8, kind: input, shape index: {}]   ;;  %s1566_s9 = inlined_call_operand.vmem [shape: f32[8,1], index: 9, kind: input, shape index: {}]   ;;  %s1567_s10 = inlined_call_operand.hbm [shape: f32[8,128], index: 10, kind: output, shape index: {0}]   ;;  %s1568_s11 = inlined_call_operand.hbm [shape: f32[8,128], index: 11, kind: output, shape index: {1}]  }
   0x1   :  { %v47_v0 = vld [vmem:[%s1557_s0] sm:$0xff]  ;;  %v48_v1 = vld [vmem:[%s1557_s0 + $0x8] sm:$0xff]  ;;  %1197 = vset.pattern.permute.xlu0 %v1263_v4  ;;  %1198 = vset.pattern.permute.xlu1 %v1263_v4  ;;  %v181_v7 = vld [vmem:[%s1559_s2 + $0x10] sm:$0xff] }
   0x2   :  { %v39_v2 = vld [vmem:[%s1558_s1] sm:$0xff]  ;;  %v1119_v3 = vpack.c.bf16 %v48_v1, %v47_v0  ;;  %v40_v6 = vld [vmem:[%s1558_s1 + $0x8] sm:$0xff]  ;;  %v41_v8 = vld [vmem:[%s1558_s1 + $0x10] sm:$0xff]  ;;  %207 = vperm.xlu1 %1198, %v181_v7  }
   0x3   :  { %994 = vmatprep.mubr.msk.f32.mxu0 %vm49_vm0, %v39_v2  ;;  %v179_v5 = vld [vmem:[%s1559_s2] sm:$0xff]  ;;  %v180_v9 = vld [vmem:[%s1559_s2 + $0x8] sm:$0xff]  ;;  %v182_v10 = vld [vmem:[%s1559_s2 + $0x18] sm:$0xff] }
   0x4   :  { %1120 = vmatprep.subr.bf16.mxu0 %v1119_v3  ;;  %197 = vperm.xlu0 %1197, %v179_v5   ;;  %v42_v11 = vld [vmem:[%s1558_s1 + $0x18] sm:$0xff]  ;;  %v43_v12 = vld [vmem:[%s1558_s1 + $0x20] sm:$0xff]  ;;  %v184_v14 = vld [vmem:[%s1559_s2 + $0x28] sm:$0xff] }
   0x5   :  { %1122 = vmatpush3.bf16.msra.mxu0 %v1119_v3  ;;  %v183_v13 = vld [vmem:[%s1559_s2 + $0x20] sm:$0xff] }
   0x6   :  { %212 = vperm.xlu1 %1198, %v182_v10  }
   0x8   :  { %995 = vmatmul.mubr.msk.f32.vlgmr.msra.gmra.mrb[0].mxu0 %vm49_vm0, %v40_v6  ;;  %202 = vperm.xlu0 %1197, %v180_v9  }
   0x9   :  { %997 = vmatprep.mubr.msk.f32.mxu0 %vm49_vm0, %v41_v8 }
   0xa   :  { %18 = vsyncpa [#allocation5], 0  ;;  %v44_v15 = vld [vmem:[%s1558_s1 + $0x28] sm:$0xff]  ;;  %v45_v16 = vld [vmem:[%s1558_s1 + $0x30] sm:$0xff]  ;;  %222 = vperm.xlu1 %1198, %v184_v14   ;;  %vm355_vm1 = vcmask 523264   ;;  %vm1265_vm2 = vmmov 0  }
   0xb   :  { %v185_v17 = vld [vmem:[%s1559_s2 + $0x30] sm:$0xff]  ;;  %v186_v18 = vld [vmem:[%s1559_s2 + $0x38] sm:$0xff]  ;;  %v267_v20 = vld [vmem:[%s1560_s3] sm:$0xff] }
   0xc   :  { %998 = vmatmul.mubr.msk.f32.gmra.mrb[2].mxu0 %vm49_vm0, %v42_v11  ;;  %217 = vperm.xlu0 %1197, %v183_v13   ;;  %v46_v19 = vld [vmem:[%s1558_s1 + $0x38] sm:$0xff]  ;;  %v268_v21 = vld [vmem:[%s1560_s3 + $0x8] sm:$0xff]  ;;  %v269_v22 = vld [vmem:[%s1560_s3 + $0x10] sm:$0xff] }
   0xd   :  { %1000 = vmatprep.mubr.msk.f32.mxu0 %vm49_vm0, %v43_v12  ;;  %v270_v23 = vld [vmem:[%s1560_s3 + $0x18] sm:$0xff]  ;;  %v271_v24 = vld [vmem:[%s1560_s3 + $0x20] sm:$0xff]  ;;  %v272_v25 = vld [vmem:[%s1560_s3 + $0x28] sm:$0xff] }
   0xe   :  { %232 = vperm.xlu1 %1198, %v186_v18   ;;  %v273_v26 = vld [vmem:[%s1560_s3 + $0x30] sm:$0xff]  ;;  %v274_v27 = vld [vmem:[%s1560_s3 + $0x38] sm:$0xff]  ;;  %v857_v28 = vld [vmem:[%s1566_s9] sm:$0xff] }
   0xf   :  { %v347_v29 = vld [vmem:[%s1562_s5] sm:$0xff]  ;;  %v188_v33 = vld [vmem:[%s1561_s4 + $0x8] sm:$0xff]  ;;  %v190_v41 = vld [vmem:[%s1561_s4 + $0x18] sm:$0xff] }
  0x10   :  { %1001 = vmatmul.mubr.msk.f32.gmra.mrb[4].mxu0 %vm49_vm0, %v44_v15  ;;  %227 = vperm.xlu0 %1197, %v185_v17   ;;  %v187_v35 = vld [vmem:[%s1561_s4] sm:$0xff]  ;;  %v189_v43 = vld [vmem:[%s1561_s4 + $0x10] sm:$0xff]  ;;  %v192_v54 = vld [vmem:[%s1561_s4 + $0x28] sm:$0xff] }
  0x11   :  { %1003 = vmatprep.mubr.msk.f32.mxu0 %vm49_vm0, %v45_v16  ;;  %1022 = vmatprep.mubr.msk.f32.mxu1 %vm355_vm1, %v347_v29  ;;  %v191_v57 = vld [vmem:[%s1561_s4 + $0x20] sm:$0xff]  ;;  %v194_v7 = vld [vmem:[%s1561_s4 + $0x38] sm:$0xff]  ;;  %v193_v11 = vld [vmem:[%s1561_s4 + $0x30] sm:$0xff] }
  0x12   :  { %306 = vperm.xlu1 %1198, %v268_v21  }
  0x14   :  { %1004 = vmatmul.mubr.msk.f32.gmra.mrb[6].mxu0 %vm49_vm0, %v46_v19  ;;  %301 = vperm.xlu0 %1197, %v267_v20  }
  0x16   :  { %316 = vperm.xlu1 %1198, %v270_v23  }
  0x18   :  { %311 = vperm.xlu0 %1197, %v269_v22  }
  0x1a   :  { %326 = vperm.xlu1 %1198, %v272_v25  }
  0x1c   :  { %321 = vperm.xlu0 %1197, %v271_v24  }
  0x1e   :  { %336 = vperm.xlu1 %1198, %v274_v27  }
  0x20   :  { %331 = vperm.xlu0 %1197, %v273_v26  }
  0x24   :  { %860 = vperm.xlu0 %1197, %v857_v28  }
  0x81   :  { %v208_v30 = vpop.permute.xlu1 %207 }
  0x82   :  { %v237_v53 = vadd.f32 %v208_v30, %v189_v43 }
  0x83   :  { %v198_v31 = vpop.permute.xlu0 %197 }
  0x84   :  { %v235_v40 = vadd.f32 %v198_v31, %v187_v35 }
  0x85   :  { %v213_v32 = vpop.permute.xlu1 %212 }
  0x86   :  { %v238_v49 = vadd.f32 %v213_v32, %v190_v41 }
  0x87   :  { %v203_v34 = vpop.permute.xlu0 %202 }
  0x88   :  { %v236_v37 = vadd.f32 %v203_v34, %v188_v33 }
  0x89   :  { %v223_v44 = vpop.permute.xlu1 %222 }
  0x8a   :  { %v240_v63 = vadd.f32 %v223_v44, %v192_v54 }
  0x8b   :  { %v218_v46 = vpop.permute.xlu0 %217 }
  0x8c   :  { %v239_v5 = vadd.f32 %v218_v46, %v191_v57 }
  0x8d   :  { %v233_v0 = vpop.permute.xlu1 %232 }
  0x8e   :  { %v242_v17 = vadd.f32 %v233_v0, %v194_v7  ;;  %v353_v7 = vld [vmem:[%s1562_s5 + $0x30] sm:$0xff] }
  0x8f   :  { %v228_v6 = vpop.permute.xlu0 %227 }
  0x90   :  { %v241_v22 = vadd.f32 %v228_v6, %v193_v11  ;;  %v352_v6 = vld [vmem:[%s1562_s5 + $0x28] sm:$0xff]  ;;  %v1266_v11 = vmov 0.0  }
  0x91   :  { %v307_v26 = vpop.permute.xlu1 %306 }
  0x93   :  { %v302_v29 = vpop.permute.xlu0 %301 }
  0xdb   :  { %v996_v36 = vpop.f32.mrb[0].mxu0 }
  0xdc   :  { %v244_v38 = vmul.f32 2.0, %v996_v36  ;;  %v140_v39 = vpop.f32.mrb[1].mxu0 }
  0xdd   :  { %v243_v42 = vmul.f32 2.0, %v140_v39  ;;  %v317_v39 = vpop.permute.xlu1 %316 }
  0xde   :  { %v252_v45 = vsub.f32 %v236_v37, %v244_v38 }
  0xdf   :  { %v251_v47 = vsub.f32 %v235_v40, %v243_v42  ;;  %v999_v48 = vpop.f32.mrb[2].mxu0  ;;  %v312_v42 = vpop.permute.xlu0 %311 }
  0xe0   :  { %v260_v50 = vmax.f32 %v252_v45, 0.0  ;;  %v246_v51 = vmul.f32 2.0, %v999_v48  ;;  %v150_v52 = vpop.f32.mrb[3].mxu0 }
  0xe1   :  { %v259_v55 = vmax.f32 %v251_v47, 0.0  ;;  %v245_v56 = vmul.f32 2.0, %v150_v52 }
  0xe2   :  { %v276_v58 = vmul.f32 -0.5, %v260_v50  ;;  %v254_v59 = vsub.f32 %v238_v49, %v246_v51  ;;  %v327_v50 = vpop.permute.xlu1 %326 }
  0xe3   :  { %v275_v60 = vmul.f32 -0.5, %v259_v55  ;;  %v253_v61 = vsub.f32 %v237_v53, %v245_v56  ;;  %v1002_v62 = vpop.f32.mrb[4].mxu0  ;;  %v322_v52 = vpop.permute.xlu0 %321 }
  0xe4   :  { %v285_v1 = vmul.f32 1.442695, %v276_v58  ;;  %v262_v2 = vmax.f32 %v254_v59, 0.0  ;;  %v248_v3 = vmul.f32 2.0, %v1002_v62  ;;  %v160_v4 = vpop.f32.mrb[5].mxu0 }
  0xe5   :  { %v283_v8 = vmul.f32 1.442695, %v275_v60  ;;  %v261_v9 = vmax.f32 %v253_v61, 0.0  ;;  %v247_v10 = vmul.f32 2.0, %v160_v4  ;;  %v350_v4 = vld [vmem:[%s1562_s5 + $0x18] sm:$0xff] }
  0xe6   :  { %1199 = vpow2.f32 %v285_v1  ;;  %v278_v12 = vmul.f32 -0.5, %v262_v2  ;;  %v256_v13 = vsub.f32 %v240_v63, %v248_v3  ;;  %v337_v59 = vpop.permute.xlu1 %336  ;;  %v348_v2 = vld [vmem:[%s1562_s5 + $0x8] sm:$0xff]  ;;  %v349_v3 = vld [vmem:[%s1562_s5 + $0x10] sm:$0xff] }
  0xe7   :  { %1201 = vpow2.f32 %v283_v8  ;;  %v277_v14 = vmul.f32 -0.5, %v261_v9  ;;  %v255_v15 = vsub.f32 %v239_v5, %v247_v10  ;;  %v1005_v16 = vpop.f32.mrb[6].mxu0  ;;  %v332_v62 = vpop.permute.xlu0 %331  ;;  %v351_v5 = vld [vmem:[%s1562_s5 + $0x20] sm:$0xff]  ;;  %v354_v8 = vld [vmem:[%s1562_s5 + $0x38] sm:$0xff]  ;;  %v1264_v9 = vmov 0.0|0.0  }
  0xe8   :  { %v289_v18 = vmul.f32 1.442695, %v278_v12  ;;  %v264_v19 = vmax.f32 %v256_v13, 0.0  ;;  %v250_v20 = vmul.f32 2.0, %v1005_v16  ;;  %v170_v21 = vpop.f32.mrb[7].mxu0  ;;  %v485_v10 = vld [vmem:[%s1563_s6] sm:$0xff] }
  0xe9   :  { %v287_v23 = vmul.f32 1.442695, %v277_v14  ;;  %v263_v24 = vmax.f32 %v255_v15, 0.0  ;;  %v249_v25 = vmul.f32 2.0, %v170_v21  ;;  %1050 = vmatprep.mubr.msk.f32.mxu0 %vm355_vm1, %v485_v10 }
  0xea   :  { %1203 = vpow2.f32 %v289_v18  ;;  %v280_v27 = vmul.f32 -0.5, %v264_v19  ;;  %v258_v28 = vsub.f32 %v242_v17, %v250_v20 }
  0xeb   :  { %1205 = vpow2.f32 %v287_v23  ;;  %v279_v30 = vmul.f32 -0.5, %v263_v24  ;;  %v257_v31 = vsub.f32 %v241_v22, %v249_v25 }
  0xec   :  { %v293_v32 = vmul.f32 1.442695, %v280_v27  ;;  %v266_v33 = vmax.f32 %v258_v28, 0.0 }
  0xed   :  { %v291_v34 = vmul.f32 1.442695, %v279_v30  ;;  %v265_v35 = vmax.f32 %v257_v31, 0.0 }
  0xee   :  { %1207 = vpow2.f32 %v293_v32  ;;  %v282_v36 = vmul.f32 -0.5, %v266_v33 }
  0xef   :  { %1209 = vpow2.f32 %v291_v34  ;;  %v281_v37 = vmul.f32 -0.5, %v265_v35 }
  0xf0   :  { %v1200_v38 = vpop.eup %1199  ;;  %v297_v40 = vmul.f32 1.442695, %v282_v36  ;;  %v486_v36 = vld [vmem:[%s1563_s6 + $0x8] sm:$0xff] }
  0xf1   :  { %v1202_v41 = vpop.eup %1201  ;;  %v295_v43 = vmul.f32 1.442695, %v281_v37  ;;  %v340_v44 = vmul.f32 %v1200_v38, %v307_v26  ;;  %v487_v37 = vld [vmem:[%s1563_s6 + $0x10] sm:$0xff]  ;;  %v488_v38 = vld [vmem:[%s1563_s6 + $0x18] sm:$0xff] }
  0xf2   :  { %1211 = vpow2.f32 %v297_v40  ;;  %v339_v45 = vmul.f32 %v1202_v41, %v302_v29  ;;  %v490_v40 = vld [vmem:[%s1563_s6 + $0x28] sm:$0xff]  ;;  %v491_v41 = vld [vmem:[%s1563_s6 + $0x30] sm:$0xff] }
  0xf3   :  { %1213 = vpow2.f32 %v295_v43  ;;  %v697_v43 = vld [vmem:[%s1565_s8] sm:$0xff] }
  0xf4   :  { %v1204_v46 = vpop.eup %1203  ;;  %v1123_v47 = vpack.c.bf16 %v340_v44, %v339_v45  ;;  %v622_v44 = vld [vmem:[%s1564_s7] sm:$0xff] }
  0xf5   :  { %v1206_v48 = vpop.eup %1205  ;;  %v342_v49 = vmul.f32 %v1204_v46, %v317_v39  ;;  %v489_v39 = vld [vmem:[%s1563_s6 + $0x20] sm:$0xff] }
  0xf6   :  { %1124 = vmatprep.subr.bf16.mxu1 %v1123_v47  ;;  %v341_v51 = vmul.f32 %v1206_v48, %v312_v42  ;;  %v492_v42 = vld [vmem:[%s1563_s6 + $0x38] sm:$0xff]  ;;  %s1267_s6 = smov [#allocation2]  }
  0xf7   :  { %1126 = vmatpush3.bf16.msra.mxu1 %v1123_v47  ;;  %s872_s7 = sshll.u32 %s1267_s6, 4  ;;  %s873_s7 = int_to_ptr.vmem [resolvable:$true] %s872_s7 }
  0xf8   :  { %v1208_v53 = vpop.eup %1207  ;;  %v1127_v54 = vpack.c.bf16 %v342_v49, %v341_v51  ;;  %s1215_s8 = scalar_lea.vmem %s873_s7, 128  ;;  %p1220_p1 = scmp.lt.s32.totalorder %s873_s7, %s873_s7 }
  0xf9   :  { %v1210_v55 = vpop.eup %1209  ;;  %v344_v56 = vmul.f32 %v1208_v53, %v327_v50  ;;  %p1216_p0 = scmp.ne.s32.totalorder %s873_s7, %s1215_s8  ;;  %p1221_p2 = scmp.lt.s32.totalorder %s1215_s8, %s1215_s8 }
  0xfa   :  { %1128 = vmatprep.subr.bf16.mxu1 %v1127_v54  ;;  %v343_v57 = vmul.f32 %v1210_v55, %v322_v52 }
  0xfb   :  { %1130 = vmatpush3.bf16.msra.mxu1 %v1127_v54  ;;  %p1222_p3 = por %p1221_p2, %p1220_p1 }
  0xfc   :  { %v1212_v58 = vpop.eup %1211  ;;  %v1131_v60 = vpack.c.bf16 %v344_v56, %v343_v57 }
  0xfd   :  { %v1214_v61 = vpop.eup %1213  ;;  %v346_v63 = vmul.f32 %v1212_v58, %v337_v59  ;;  %p1223_p4 = pnand %p1222_p3, %p1216_p0 }
  0xfe   :  { %1132 = vmatprep.subr.bf16.mxu1 %v1131_v60  ;;  %v345_v0 = vmul.f32 %v1214_v61, %v332_v62 }
  0xff   :  { %1134 = vmatpush3.bf16.msra.mxu1 %v1131_v60 }
 0x100   :  { %v1135_v1 = vpack.c.bf16 %v346_v63, %v345_v0 }
 0x102   :  { %1136 = vmatprep.subr.bf16.mxu1 %v1135_v1 }
 0x103   :  { %1138 = vmatpush3.bf16.msra.mxu1 %v1135_v1 }
 0x104   :  { %1155 = vmatprep.subr.bf16.mxu1 %v1264_v9 }
 0x106   :  { %1023 = vmatmul.mubr.msk.f32.vlgmr.msra.gmra.mrb[0].mxu1 %vm355_vm1, %v348_v2 }
 0x107   :  { %1025 = vmatprep.mubr.msk.f32.mxu1 %vm355_vm1, %v349_v3 }
 0x10a   :  { %1026 = vmatmul.mubr.msk.f32.gmra.mrb[2].mxu1 %vm355_vm1, %v350_v4 }
 0x10b   :  { %1028 = vmatprep.mubr.msk.f32.mxu1 %vm355_vm1, %v351_v5 }
 0x10e   :  { %1029 = vmatmul.mubr.msk.f32.gmra.mrb[4].mxu1 %vm355_vm1, %v352_v6 }
 0x10f   :  { %1031 = vmatprep.mubr.msk.f32.mxu1 %vm355_vm1, %v353_v7 }
 0x112   :  { %1032 = vmatmul.mubr.msk.f32.gmra.mrb[6].mxu1 %vm355_vm1, %v354_v8 }
 0x113   :  { %1078 = vmatprep.mubr.msk.f32.mxu1 %vm1265_vm2, %v1266_v11 }
 0x1d9   :  { %v1024_v12 = vpop.f32.mrb[0].mxu1 }
 0x1da   :  { %v699_v13 = vmul.f32 %v1024_v12, %v1024_v12  ;;  %v446_v14 = vpop.f32.mrb[1].mxu1 }
 0x1db   :  { %v1139_v15 = vpack.c.bf16 %v1024_v12, %v446_v14  ;;  %v698_v16 = vmul.f32 %v446_v14, %v446_v14 }
 0x1dd   :  { %v1168_v17 = vpack.c.bf16 %v699_v13, %v698_v16  ;;  %v1027_v18 = vpop.f32.mrb[2].mxu1  ;;  %1140 = vmatprep.subr.bf16.mxu0 %v1139_v15  ;;  %1157 = vmatpush3.bf16.msra.mxu1 %v1139_v15 }
 0x1de   :  { %v701_v19 = vmul.f32 %v1027_v18, %v1027_v18  ;;  %v456_v20 = vpop.f32.mrb[3].mxu1  ;;  %1142 = vmatpush3.bf16.msra.mxu0 %v1139_v15  ;;  %1158 = vmatprep.subr.bf16.mxu1 %v1264_v9 }
 0x1df   :  { %v1143_v21 = vpack.c.bf16 %v1027_v18, %v456_v20  ;;  %v700_v22 = vmul.f32 %v456_v20, %v456_v20 }
 0x1e1   :  { %v1171_v23 = vpack.c.bf16 %v701_v19, %v700_v22  ;;  %v1030_v24 = vpop.f32.mrb[4].mxu1  ;;  %1144 = vmatprep.subr.bf16.mxu0 %v1143_v21  ;;  %1160 = vmatpush3.bf16.msra.mxu1 %v1143_v21 }
 0x1e2   :  { %v703_v25 = vmul.f32 %v1030_v24, %v1030_v24  ;;  %v466_v26 = vpop.f32.mrb[5].mxu1  ;;  %1146 = vmatpush3.bf16.msra.mxu0 %v1143_v21  ;;  %1161 = vmatprep.subr.bf16.mxu1 %v1264_v9 }
 0x1e3   :  { %v1147_v27 = vpack.c.bf16 %v1030_v24, %v466_v26  ;;  %v702_v28 = vmul.f32 %v466_v26, %v466_v26 }
 0x1e5   :  { %v1174_v29 = vpack.c.bf16 %v703_v25, %v702_v28  ;;  %v1033_v30 = vpop.f32.mrb[6].mxu1  ;;  %1148 = vmatprep.subr.bf16.mxu0 %v1147_v27  ;;  %1163 = vmatpush3.bf16.msra.mxu1 %v1147_v27 }
 0x1e6   :  { %v705_v31 = vmul.f32 %v1033_v30, %v1033_v30  ;;  %v476_v32 = vpop.f32.mrb[7].mxu1  ;;  %1150 = vmatpush3.bf16.msra.mxu0 %v1147_v27  ;;  %1164 = vmatprep.subr.bf16.mxu1 %v1264_v9 }
 0x1e7   :  { %v1151_v33 = vpack.c.bf16 %v1033_v30, %v476_v32  ;;  %v704_v34 = vmul.f32 %v476_v32, %v476_v32 }
 0x1e9   :  { %v1177_v35 = vpack.c.bf16 %v705_v31, %v704_v34  ;;  %1152 = vmatprep.subr.bf16.mxu0 %v1151_v33  ;;  %1166 = vmatpush3.bf16.msra.mxu1 %v1151_v33 }
 0x1ea   :  { %1154 = vmatpush3.bf16.msra.mxu0 %v1151_v33  ;;  %1179 = vmatprep.subr.bf16.mxu1 %v1264_v9 }
 0x1eb   :  { %1167 = vmatprep.subr.bf16.mxu0 %v1264_v9 }
 0x1ec   :  { %1079 = vmatmul.mubr.msk.f32.vlgmr.msra.gmra.mrb[8].mxu1 %vm355_vm1, %v622_v44 }
 0x1ed   :  { %1051 = vmatmul.mubr.msk.f32.vlgmr.msra.gmra.mrb[8].mxu0 %vm355_vm1, %v486_v36  ;;  %1116 = vmatprep.mubr.msk.f32.mxu1 %vm1265_vm2, %v1266_v11 }
 0x1ee   :  { %1169 = vmatpush3.bf16.msra.mxu0 %v1168_v17  ;;  %1053 = vmatprep.mubr.msk.f32.mxu0 %vm355_vm1, %v487_v37 }
 0x1ef   :  { %1170 = vmatprep.subr.bf16.mxu0 %v1264_v9 }
 0x1f1   :  { %1054 = vmatmul.mubr.msk.f32.gmra.mrb[10].mxu0 %vm355_vm1, %v488_v38 }
 0x1f2   :  { %1172 = vmatpush3.bf16.msra.mxu0 %v1171_v23  ;;  %1056 = vmatprep.mubr.msk.f32.mxu0 %vm355_vm1, %v489_v39 }
 0x1f3   :  { %1173 = vmatprep.subr.bf16.mxu0 %v1264_v9 }
 0x1f5   :  { %1057 = vmatmul.mubr.msk.f32.gmra.mrb[12].mxu0 %vm355_vm1, %v490_v40 }
 0x1f6   :  { %1175 = vmatpush3.bf16.msra.mxu0 %v1174_v29  ;;  %1059 = vmatprep.mubr.msk.f32.mxu0 %vm355_vm1, %v491_v41 }
 0x1f7   :  { %1176 = vmatprep.subr.bf16.mxu0 %v1264_v9 }
 0x1f9   :  { %1060 = vmatmul.mubr.msk.f32.gmra.mrb[14].mxu0 %vm355_vm1, %v492_v42 }
 0x1fa   :  { %1178 = vmatpush3.bf16.msra.mxu0 %v1177_v35  ;;  %1097 = vmatprep.mubr.msk.f32.mxu0 %vm1265_vm2, %v1266_v11 }
 0x1fd   :  { %1098 = vmatmul.mubr.msk.f32.vlgmr.msra.gmra.mrb[16].mxu0 %vm355_vm1, %v697_v43 }
 0x2bf   :  { %v692_v3 = vpop.f32.mrb[8].mxu1 }
 0x2c0   :  { %v1052_v45 = vpop.f32.mrb[8].mxu0  ;;  %696 = vst [vmem:[#allocation2] sm:$0xff] %v692_v3  ;;  %v1080_v4 = vpop.f32.mrb[9].mxu1 }
 0x2c1   :  { %v780_v46 = vmul.f32 %v1052_v45, %v1052_v45  ;;  %v583_v47 = vpop.f32.mrb[9].mxu0 }
 0x2c2   :  { %v779_v48 = vmul.f32 %v583_v47, %v583_v47 }
 0x2c4   :  { %v1180_v49 = vpack.c.bf16 %v780_v46, %v779_v48  ;;  %v1055_v50 = vpop.f32.mrb[10].mxu0 }
 0x2c5   :  { %v782_v51 = vmul.f32 %v1055_v50, %v1055_v50  ;;  %v593_v52 = vpop.f32.mrb[11].mxu0 }
 0x2c6   :  { %v781_v53 = vmul.f32 %v593_v52, %v593_v52  ;;  %1181 = vmatpush3.bf16.msra.mxu1 %v1180_v49 }
 0x2c7   :  { %1182 = vmatprep.subr.bf16.mxu1 %v1264_v9 }
 0x2c8   :  { %v1183_v54 = vpack.c.bf16 %v782_v51, %v781_v53  ;;  %v1058_v55 = vpop.f32.mrb[12].mxu0 }
 0x2c9   :  { %v784_v56 = vmul.f32 %v1058_v55, %v1058_v55  ;;  %v603_v57 = vpop.f32.mrb[13].mxu0 }
 0x2ca   :  { %v783_v58 = vmul.f32 %v603_v57, %v603_v57  ;;  %1184 = vmatpush3.bf16.msra.mxu1 %v1183_v54 }
 0x2cb   :  { %1185 = vmatprep.subr.bf16.mxu1 %v1264_v9 }
 0x2cc   :  { %v1186_v59 = vpack.c.bf16 %v784_v56, %v783_v58  ;;  %v1061_v60 = vpop.f32.mrb[14].mxu0 }
 0x2cd   :  { %v786_v61 = vmul.f32 %v1061_v60, %v1061_v60  ;;  %v613_v62 = vpop.f32.mrb[15].mxu0 }
 0x2ce   :  { %v785_v63 = vmul.f32 %v613_v62, %v613_v62  ;;  %1187 = vmatpush3.bf16.msra.mxu1 %v1186_v59 }
 0x2cf   :  { %1188 = vmatprep.subr.bf16.mxu1 %v1264_v9 }
 0x2d0   :  { %v1189_v0 = vpack.c.bf16 %v786_v61, %v785_v63  ;;  %v775_v1 = vpop.f32.mrb[16].mxu0 }
 0x2d1   :  { %v1099_v2 = vpop.f32.mrb[17].mxu0 }
 0x2d2   :  { %1190 = vmatpush3.bf16.msra.mxu1 %v1189_v0 }
 0x2d5   :  { %1117 = vmatmul.mubr.msk.f32.vlgmr.msra.gmra.mrb[10].mxu1 %vm355_vm1, %v697_v43 }
 0x2d6   :  { %1226 = shalt.err (!%p1223_p4)
}
 0x2d7   :  { %s1227_s12 = scalar_lea.hbm %s1567_s10, 128 }
 0x2d8   :  { %p1228_p5 = scmp.ne.s32.totalorder %s1567_s10, %s1227_s12  ;;  %p1231_p6 = scmp.lt.u32.totalorder %s1227_s12, %s1567_s10 }
 0x2da   :  { %p1233_p7 = pnand %p1231_p6, %p1228_p5 }
 0x2dc   :  { %1236 = shalt.err (!%p1233_p7)
}
 0x2dd   :  { %875 = dma.vmem_to_hbm [thread:$0]  %s873_s7, 128, %s1567_s10, [#allocation3]   ;;  %v861_v5 = vpop.permute.xlu0 %860 }
 0x2de   :  { %s1268_s16 = smov [#allocation4]   ;;  %v863_v6 = vsub.f32 %v861_v5, %v775_v1 }
 0x2df   :  { %s882_s2 = sshll.u32 %s1268_s16, 4  ;;  %s883_s2 = int_to_ptr.vmem [resolvable:$true] %s882_s2 }
 0x2e0   :  { %s1237_s17 = scalar_lea.vmem %s883_s2, 128  ;;  %p1242_p9 = scmp.lt.s32.totalorder %s883_s2, %s883_s2 }
 0x2e1   :  { %p1238_p8 = scmp.ne.s32.totalorder %s883_s2, %s1237_s17  ;;  %p1243_p10 = scmp.lt.s32.totalorder %s1237_s17, %s1237_s17 }
 0x2e3   :  { %p1244_p11 = por %p1243_p10, %p1242_p9 }
 0x2e5   :  { %p1245_p12 = pnand %p1244_p11, %p1238_p8 }
 0x3a8   :  { %v853_v7 = vpop.f32.mrb[10].mxu1 }
 0x3a9   :  { %v864_v8 = vadd.f32 %v863_v6, %v853_v7  ;;  %v1118_v9 = vpop.f32.mrb[11].mxu1 }
 0x3ab   :  { %865 = vst [vmem:[#allocation4] sm:$0xff] %v864_v8 }
 0x3ac   :  { %1248 = shalt.err (!%p1245_p12)
}
 0x3ad   :  { %s1249_s10 = scalar_lea.hbm %s1568_s11, 128 }
 0x3ae   :  { %p1250_p13 = scmp.ne.s32.totalorder %s1568_s11, %s1249_s10  ;;  %p1253_p0 = scmp.lt.u32.totalorder %s1249_s10, %s1568_s11 }
 0x3b0   :  { %p1255_p1 = pnand %p1253_p0, %p1250_p13 }
 0x3b2   :  { %1258 = shalt.err (!%p1255_p1)
}
 0x3b3   :  { %885 = dma.vmem_to_hbm [thread:$0]  %s883_s2, 128, %s1568_s11, [#allocation5]  }
 0x3b4   :  { %1259 = dma.done.wait [#allocation3], 128  }
 0x3b5   :  { %1260 = vsyncadd [#allocation3], 4294967168 }
 0x3b6   :  { %1261 = dma.done.wait [#allocation5], 128  }
 0x3b7   :  { %1262 = vsyncadd [#allocation5], 4294967168 }
 0x3b8   :  { %892 = vsyncpa [#allocation3], 1 }
 0x3b9   :  { %893 = vsyncpa [#allocation5], 1 }

</bundles_post_ra>
